<compile_context>
chip_gen: v7x
topology: tpu7x:2x2x1
jax: 0.10.0
libtpu: 0.0.40
codegen_flags: <defaults>
</compile_context>

<pallas_src>
import math

import jax
import jax.numpy as jnp
from jax.experimental import pallas as pl
from jax.experimental.pallas import tpu as pltpu

NEG_INF = -1e30  # finite "minus infinity": keeps the online-softmax NaN-free


def _make_flash_kernel(has_bias: bool):
    """Build the per-(batch, head, q-tile, kv-tile) flash-attention kernel.

    Block views (leading batch/head dims squeezed away by the BlockSpecs):
      q_ref   : (tq, hd)   bf16, scale already folded into the Q projection
      k_ref   : (tk, hd)   bf16
      v_ref   : (tk, hd)   bf16
      bias_ref: (1, tk)    f32 additive key-padding bias (0 or NEG_INF), only
                           present when has_bias
      o_ref   : (tq, hd)   f32, written once on the last kv step

    Scratch (persists across the kv grid axis):
      m_sc  : (tq, 1)  f32 running row max
      l_sc  : (tq, 1)  f32 running softmax denominator
      acc_sc: (tq, hd) f32 running unnormalized P @ V accumulator
    """

    def kernel(*refs):
        if has_bias:
            bias_ref, q_ref, k_ref, v_ref, o_ref, m_sc, l_sc, acc_sc = refs
        else:
            q_ref, k_ref, v_ref, o_ref, m_sc, l_sc, acc_sc = refs
            bias_ref = None

        ki = pl.program_id(3)

        @pl.when(ki == 0)
        def _init():
            m_sc[...] = jnp.full(m_sc.shape, NEG_INF, jnp.float32)
            l_sc[...] = jnp.zeros(l_sc.shape, jnp.float32)
            acc_sc[...] = jnp.zeros(acc_sc.shape, jnp.float32)

        q = q_ref[...]  # (tq, hd) bf16
        k = k_ref[...]  # (tk, hd) bf16
        v = v_ref[...]  # (tk, hd) bf16

        # scores = q @ k^T on the MXU, f32 accumulation.
        s = jax.lax.dot_general(q, k, (((1,), (1,)), ((), ())),
                                preferred_element_type=jnp.float32)  # (tq, tk)
        if has_bias:
            s = s + bias_ref[...]  # (1, tk) broadcast over q rows, f32

        m_prev = m_sc[...]                                          # (tq, 1)
        m_new = jnp.maximum(m_prev, jnp.max(s, axis=-1, keepdims=True))
        alpha = jnp.exp(m_prev - m_new)                             # rescale
        p = jnp.exp(s - m_new)                                      # f32 unnorm

        l_sc[...] = alpha * l_sc[...] + jnp.sum(p, axis=-1, keepdims=True)
        acc_sc[...] = alpha * acc_sc[...] + jnp.dot(
            p.astype(v.dtype), v, preferred_element_type=jnp.float32)
        m_sc[...] = m_new

        # Deferred normalization + single store on the last kv step.
        @pl.when(ki == pl.num_programs(3) - 1)
        def _finalize():
            inv_l = pl.reciprocal(l_sc[...], approx=True)           # EUP slot
            o_ref[...] = (acc_sc[...] * inv_l).astype(o_ref.dtype)

    return kernel


def _pick_tile(s, candidates):
    """Largest candidate tile that evenly divides s, else the full extent."""
    for t in candidates:
        if s % t == 0:
            return t
    return s


def pallas_mha_attention(q, k, v, key_padding_mask, n_heads):
    """q, k, v: [B, S, D] already projected (q pre-scaled by 1/sqrt(hd)).
    key_padding_mask: [B, S_k] bool (True = padded key) or None."""
    B, S_q, D = q.shape
    S_k = k.shape[1]
    H = n_heads
    hd = D // H

    # [B, S, D] -> [B, H, S, hd]: head-major layout so the kernel gets plain
    # contiguous 2-D tiles per (batch, head).  Cast to bf16 for the MXU; score
    # accumulation and softmax statistics stay f32 inside the kernel.
    qh = q.reshape(B, S_q, H, hd).transpose(0, 2, 1, 3).astype(jnp.bfloat16)
    kh = k.reshape(B, S_k, H, hd).transpose(0, 2, 1, 3).astype(jnp.bfloat16)
    vh = v.reshape(B, S_k, H, hd).transpose(0, 2, 1, 3).astype(jnp.bfloat16)

    has_bias = key_padding_mask is not None

    # Flash tiling along both sequence axes (128-multiples or full extent).
    tq = _pick_tile(S_q, (512, 256, 128))
    tk = _pick_tile(S_k, (1024, 512, 256, 128))
    grid = (B, H, S_q // tq, S_k // tk)

    q_spec = pl.BlockSpec((None, None, tq, hd), lambda b, h, qi, ki: (b, h, qi, 0))
    kv_spec = pl.BlockSpec((None, None, tk, hd), lambda b, h, qi, ki: (b, h, ki, 0))
    out_spec = pl.BlockSpec((None, None, tq, hd), lambda b, h, qi, ki: (b, h, qi, 0))

    in_specs = [q_spec, kv_spec, kv_spec]
    args = [qh, kh, vh]
    if has_bias:
        # Additive mask bias precomputed once (0 keep / NEG_INF pad), f32.
        bias = jnp.where(key_padding_mask.astype(bool),
                         jnp.float32(NEG_INF), jnp.float32(0.0))
        bias = bias[:, None, :]  # [B, 1, S_k] so the block's last-2 dims are (1, tk)
        bias_spec = pl.BlockSpec((None, 1, tk), lambda b, h, qi, ki: (b, 0, ki))
        in_specs = [bias_spec] + in_specs
        args = [bias] + args

    out = pl.pallas_call(
        _make_flash_kernel(has_bias),
        out_shape=jax.ShapeDtypeStruct((B, H, S_q, hd), jnp.float32),
        grid_spec=pltpu.PrefetchScalarGridSpec(
            num_scalar_prefetch=0,
            grid=grid,
            in_specs=in_specs,
            out_specs=out_spec,
            scratch_shapes=[
                pltpu.VMEM((tq, 1), jnp.float32),    # running max m
                pltpu.VMEM((tq, 1), jnp.float32),    # running denom l
                pltpu.VMEM((tq, hd), jnp.float32),   # P @ V accumulator
            ]),
        compiler_params=pltpu.CompilerParams(
            dimension_semantics=("parallel", "parallel", "parallel", "arbitrary"),
            vmem_limit_bytes=48 * 1024 * 1024),
    )(*args)

    # [B, H, S, hd] -> [B, S, H, hd] -> [B, S, D]
    return out.transpose(0, 2, 1, 3).reshape(B, S_q, D)


class StandardMHAPallas:
    """JAX/Pallas equivalent of the PyTorch StandardMHA module (forward only)."""

    def __init__(self, d_model: int, n_heads: int, key):
        assert d_model % n_heads == 0
        self.d_model = d_model
        self.n_heads = n_heads
        k1, k2 = jax.random.split(key)
        # nn.MultiheadAttention: in_proj_weight [3D, D] xavier_uniform,
        # in_proj_bias zeros, out_proj Linear(D, D) with zero bias.
        limit_in = math.sqrt(6.0 / (3 * d_model + d_model))
        self.in_proj_weight = jax.random.uniform(
            k1, (3 * d_model, d_model), jnp.float32, -limit_in, limit_in)
        self.in_proj_bias = jnp.zeros((3 * d_model,), jnp.float32)
        limit_out = math.sqrt(1.0 / d_model)
        self.out_proj_weight = jax.random.uniform(
            k2, (d_model, d_model), jnp.float32, -limit_out, limit_out)
        self.out_proj_bias = jnp.zeros((d_model,), jnp.float32)

    def __call__(self, query, key, value, key_padding_mask=None):
        D, H = self.d_model, self.n_heads
        hd = D // H
        scale = 1.0 / math.sqrt(hd)
        Wq, Wk, Wv = (self.in_proj_weight[:D],
                      self.in_proj_weight[D:2 * D],
                      self.in_proj_weight[2 * D:])
        bq, bk, bv = (self.in_proj_bias[:D],
                      self.in_proj_bias[D:2 * D],
                      self.in_proj_bias[2 * D:])

        # Fold 1/sqrt(hd) into the Q projection (no per-score scaling later).
        q = query @ (Wq * scale).T + bq * scale
        k = key @ Wk.T + bk
        v = value @ Wv.T + bv

        attn_out = pallas_mha_attention(q, k, v, key_padding_mask, H)

        # output projection
        return attn_out @ self.out_proj_weight.T + self.out_proj_bias


def _reference_mha(module, query, key, value, key_padding_mask):
    """Pure-jnp f32 reference for the correctness check."""
    D, H = module.d_model, module.n_heads
    hd = D // H
    Wq, Wk, Wv = (module.in_proj_weight[:D],
                  module.in_proj_weight[D:2 * D],
                  module.in_proj_weight[2 * D:])
    q = query @ Wq.T
    k = key @ Wk.T
    v = value @ Wv.T
    B, S_q = q.shape[0], q.shape[1]
    S_k = k.shape[1]
    qh = q.reshape(B, S_q, H, hd).transpose(0, 2, 1, 3)
    kh = k.reshape(B, S_k, H, hd).transpose(0, 2, 1, 3)
    vh = v.reshape(B, S_k, H, hd).transpose(0, 2, 1, 3)
    s = jnp.einsum("bhqd,bhkd->bhqk", qh, kh) / math.sqrt(hd)
    if key_padding_mask is not None:
        s = jnp.where(key_padding_mask[:, None, None, :], NEG_INF, s)
    p = jax.nn.softmax(s, axis=-1)
    o = jnp.einsum("bhqk,bhkd->bhqd", p, vh)
    o = o.transpose(0, 2, 1, 3).reshape(B, S_q, D)
    return o @ module.out_proj_weight.T + module.out_proj_bias


def _check(out, ref, tag):
    err = float(jnp.max(jnp.abs(out - ref)))
    # bf16 q/k/v + bf16 p feed the MXU; f32 softmax stats -> bf16-level tol.
    assert jnp.allclose(out, ref, atol=5e-2, rtol=5e-2), (tag, err)


if __name__ == "__main__":
    key = jax.random.PRNGKey(0)
    k_mod, k_q, k_k, k_v, k_mod2, k_q2, k_k2, k_v2 = jax.random.split(key, 8)

    # --- Small smoke test (single block, hd=8) ---------------------------
    B, S, D, H = 2, 8, 32, 4
    mha = StandardMHAPallas(D, H, k_mod)

    query = jax.random.normal(k_q, (B, S, D), jnp.float32)
    key_in = jax.random.normal(k_k, (B, S, D), jnp.float32)
    value = jax.random.normal(k_v, (B, S, D), jnp.float32)
    # True = padding position (last 2 keys of batch 1 padded)
    key_padding_mask = jnp.zeros((B, S), dtype=bool).at[1, -2:].set(True)

    out = jax.block_until_ready(
        mha(query, key_in, value, key_padding_mask=key_padding_mask))
    assert out.shape == (B, S, D)
    _check(out, _reference_mha(mha, query, key_in, value, key_padding_mask),
           "small+mask")

    # no-mask fast path (bias operand dropped entirely)
    out_nm = jax.block_until_ready(mha(query, key_in, value))
    _check(out_nm, _reference_mha(mha, query, key_in, value, None), "small+nomask")

    # --- Tiled test: multiple q and kv tiles, hd=64, mask spans tiles ----
    B2, S2, D2, H2 = 2, 384, 256, 4   # tq = tk = 128 -> 3 x 3 tiles per (b, h)
    mha2 = StandardMHAPallas(D2, H2, k_mod2)
    query2 = jax.random.normal(k_q2, (B2, S2, D2), jnp.float32)
    key_in2 = jax.random.normal(k_k2, (B2, S2, D2), jnp.float32)
    value2 = jax.random.normal(k_v2, (B2, S2, D2), jnp.float32)
    # padding crosses a kv-tile boundary (last 130 keys of batch 0 padded)
    mask2 = jnp.zeros((B2, S2), dtype=bool).at[0, -130:].set(True)

    out2 = jax.block_until_ready(
        mha2(query2, key_in2, value2, key_padding_mask=mask2))
    assert out2.shape == (B2, S2, D2)
    _check(out2, _reference_mha(mha2, query2, key_in2, value2, mask2),
           "tiled+mask")

    print("KERNEL_OK")
</pallas_src>

<mosaic_0001>
module attributes {stable_mosaic.version = 11 : i64} {
  func.func @kernel(%arg0: i32, %arg1: i32, %arg2: i32, %arg3: i32, %arg4: memref<1x1x8xf32, #tpu.memory_space<vmem>>, %arg5: memref<1x1x8x8xbf16, #tpu.memory_space<vmem>>, %arg6: memref<1x1x8x8xbf16, #tpu.memory_space<vmem>>, %arg7: memref<1x1x8x8xbf16, #tpu.memory_space<vmem>>, %arg8: memref<1x1x8x8xf32, #tpu.memory_space<vmem>>, %arg9: memref<8x1xf32, #tpu.memory_space<vmem>>, %arg10: memref<8x1xf32, #tpu.memory_space<vmem>>, %arg11: memref<8x8xf32, #tpu.memory_space<vmem>>) attributes {dimension_semantics = [#tpu.dimension_semantics<parallel>, #tpu.dimension_semantics<parallel>, #tpu.dimension_semantics<parallel>, #tpu.dimension_semantics<arbitrary>], iteration_bounds = array<i64: 2, 4, 1, 1>, scalar_prefetch = 0 : i64, scratch_operands = 3 : i64, tpu.core_type = #tpu.core_type<tc>, window_params = [{transform_indices = @transform_0, window_bounds = array<i64: 1, 1, 8>}, {transform_indices = @transform_1, window_bounds = array<i64: 1, 1, 8, 8>}, {transform_indices = @transform_2, window_bounds = array<i64: 1, 1, 8, 8>}, {transform_indices = @transform_3, window_bounds = array<i64: 1, 1, 8, 8>}, {transform_indices = @transform_4, window_bounds = array<i64: 1, 1, 8, 8>}]} {
    %c0_i32 = arith.constant 0 : i32
    %0 = arith.cmpi eq, %arg3, %c0_i32 : i32
    %1 = arith.extui %0 : i1 to i32
    %c0_i32_0 = arith.constant 0 : i32
    %2 = arith.cmpi ne, %1, %c0_i32_0 : i32
    scf.if %2 {
      %cst_32 = arith.constant -1.000000e+30 : f32
      %40 = vector.broadcast %cst_32 : f32 to vector<8x1xf32>
      %c0_33 = arith.constant 0 : index
      %c0_34 = arith.constant 0 : index
      %41 = vector.load %arg9[%c0_33, %c0_34] : memref<8x1xf32, #tpu.memory_space<vmem>>, vector<8x1xf32>
      tpu.vector_store %arg9[%c0_33, %c0_34], %40 {strides = array<i32>} : memref<8x1xf32, #tpu.memory_space<vmem>>, vector<8x1xf32>,
      %cst_35 = arith.constant 0.000000e+00 : f32
      %42 = vector.broadcast %cst_35 : f32 to vector<8x1xf32>
      %c0_36 = arith.constant 0 : index
      %c0_37 = arith.constant 0 : index
      %43 = vector.load %arg10[%c0_36, %c0_37] : memref<8x1xf32, #tpu.memory_space<vmem>>, vector<8x1xf32>
      tpu.vector_store %arg10[%c0_36, %c0_37], %42 {strides = array<i32>} : memref<8x1xf32, #tpu.memory_space<vmem>>, vector<8x1xf32>,
      %cst_38 = arith.constant 0.000000e+00 : f32
      %44 = vector.broadcast %cst_38 : f32 to vector<8x8xf32>
      %c0_39 = arith.constant 0 : index
      %c0_40 = arith.constant 0 : index
      %45 = vector.load %arg11[%c0_39, %c0_40] : memref<8x8xf32, #tpu.memory_space<vmem>>, vector<8x8xf32>
      tpu.vector_store %arg11[%c0_39, %c0_40], %44 {strides = array<i32>} : memref<8x8xf32, #tpu.memory_space<vmem>>, vector<8x8xf32>,
    } else {
    }
    %c0 = arith.constant 0 : index
    %c0_1 = arith.constant 0 : index
    %c0_2 = arith.constant 0 : index
    %c0_3 = arith.constant 0 : index
    %3 = vector.load %arg5[%c0, %c0_1, %c0_2, %c0_3] : memref<1x1x8x8xbf16, #tpu.memory_space<vmem>>, vector<1x1x8x8xbf16>
    %4 = vector.shape_cast %3 : vector<1x1x8x8xbf16> to vector<8x8xbf16>
    %c0_4 = arith.constant 0 : index
    %c0_5 = arith.constant 0 : index
    %c0_6 = arith.constant 0 : index
    %c0_7 = arith.constant 0 : index
    %5 = vector.load %arg6[%c0_4, %c0_5, %c0_6, %c0_7] : memref<1x1x8x8xbf16, #tpu.memory_space<vmem>>, vector<1x1x8x8xbf16>
    %6 = vector.shape_cast %5 : vector<1x1x8x8xbf16> to vector<8x8xbf16>
    %c0_8 = arith.constant 0 : index
    %c0_9 = arith.constant 0 : index
    %c0_10 = arith.constant 0 : index
    %c0_11 = arith.constant 0 : index
    %7 = vector.load %arg7[%c0_8, %c0_9, %c0_10, %c0_11] : memref<1x1x8x8xbf16, #tpu.memory_space<vmem>>, vector<1x1x8x8xbf16>
    %8 = vector.shape_cast %7 : vector<1x1x8x8xbf16> to vector<8x8xbf16>
    %cst = arith.constant dense<0.000000e+00> : vector<8x8xf32>
    %9 = tpu.matmul %4, %6, %cst {dimension_numbers = #tpu.dot_dimension_numbers<[1], [1], [0], [0], [0, 0, 1, 0], [], []>} : vector<8x8xbf16>, vector<8x8xbf16>, vector<8x8xf32> -> vector<8x8xf32>
    %c0_12 = arith.constant 0 : index
    %c0_13 = arith.constant 0 : index
    %c0_14 = arith.constant 0 : index
    %10 = vector.load %arg4[%c0_12, %c0_13, %c0_14] : memref<1x1x8xf32, #tpu.memory_space<vmem>>, vector<1x1x8xf32>
    %11 = vector.shape_cast %10 : vector<1x1x8xf32> to vector<1x8xf32>
    %12 = vector.broadcast %11 : vector<1x8xf32> to vector<8x8xf32>
    %13 = arith.addf %9, %12 : vector<8x8xf32>
    %c0_15 = arith.constant 0 : index
    %c0_16 = arith.constant 0 : index
    %14 = vector.load %arg9[%c0_15, %c0_16] : memref<8x1xf32, #tpu.memory_space<vmem>>, vector<8x1xf32>
    %cst_17 = arith.constant dense<0xFF800000> : vector<8xf32>
    %15 = vector.multi_reduction <maximumf>, %13, %cst_17 [1] : vector<8x8xf32> to vector<8xf32>
    %16 = vector.shape_cast %15 : vector<8xf32> to vector<8x1xf32>
    %17 = arith.maximumf %14, %16 : vector<8x1xf32>
    %18 = arith.subf %14, %17 : vector<8x1xf32>
    %19 = math.exp %18 : vector<8x1xf32>
    %20 = vector.broadcast %17 : vector<8x1xf32> to vector<8x8xf32>
    %21 = arith.subf %13, %20 : vector<8x8xf32>
    %22 = math.exp %21 : vector<8x8xf32>
    %c0_18 = arith.constant 0 : index
    %c0_19 = arith.constant 0 : index
    %23 = vector.load %arg10[%c0_18, %c0_19] : memref<8x1xf32, #tpu.memory_space<vmem>>, vector<8x1xf32>
    %24 = arith.mulf %19, %23 : vector<8x1xf32>
    %cst_20 = arith.constant dense<0.000000e+00> : vector<8xf32>
    %25 = vector.multi_reduction <add>, %22, %cst_20 [1] : vector<8x8xf32> to vector<8xf32>
    %26 = vector.shape_cast %25 : vector<8xf32> to vector<8x1xf32>
    %27 = arith.addf %24, %26 : vector<8x1xf32>
    %c0_21 = arith.constant 0 : index
    %c0_22 = arith.constant 0 : index
    %28 = vector.load %arg10[%c0_21, %c0_22] : memref<8x1xf32, #tpu.memory_space<vmem>>, vector<8x1xf32>
    tpu.vector_store %arg10[%c0_21, %c0_22], %27 {strides = array<i32>} : memref<8x1xf32, #tpu.memory_space<vmem>>, vector<8x1xf32>,
    %c0_23 = arith.constant 0 : index
    %c0_24 = arith.constant 0 : index
    %29 = vector.load %arg11[%c0_23, %c0_24] : memref<8x8xf32, #tpu.memory_space<vmem>>, vector<8x8xf32>
    %30 = vector.broadcast %19 : vector<8x1xf32> to vector<8x8xf32>
    %31 = arith.mulf %30, %29 : vector<8x8xf32>
    %32 = arith.truncf %22 : vector<8x8xf32> to vector<8x8xbf16>
    %cst_25 = arith.constant dense<0.000000e+00> : vector<8x8xf32>
    %33 = tpu.matmul %32, %8, %cst_25 {dimension_numbers = #tpu.dot_dimension_numbers<[1], [0], [0], [1], [0, 0, 1, 1], [], []>} : vector<8x8xbf16>, vector<8x8xbf16>, vector<8x8xf32> -> vector<8x8xf32>
    %34 = arith.addf %31, %33 : vector<8x8xf32>
    %c0_26 = arith.constant 0 : index
    %c0_27 = arith.constant 0 : index
    %35 = vector.load %arg11[%c0_26, %c0_27] : memref<8x8xf32, #tpu.memory_space<vmem>>, vector<8x8xf32>
    tpu.vector_store %arg11[%c0_26, %c0_27], %34 {strides = array<i32>} : memref<8x8xf32, #tpu.memory_space<vmem>>, vector<8x8xf32>,
    %c0_28 = arith.constant 0 : index
    %c0_29 = arith.constant 0 : index
    %36 = vector.load %arg9[%c0_28, %c0_29] : memref<8x1xf32, #tpu.memory_space<vmem>>, vector<8x1xf32>
    tpu.vector_store %arg9[%c0_28, %c0_29], %17 {strides = array<i32>} : memref<8x1xf32, #tpu.memory_space<vmem>>, vector<8x1xf32>,
    %c0_i32_30 = arith.constant 0 : i32
    %37 = arith.cmpi eq, %arg3, %c0_i32_30 : i32
    %38 = arith.extui %37 : i1 to i32
    %c0_i32_31 = arith.constant 0 : i32
    %39 = arith.cmpi ne, %38, %c0_i32_31 : i32
    scf.if %39 {
      %c0_32 = arith.constant 0 : index
      %c0_33 = arith.constant 0 : index
      %40 = vector.load %arg10[%c0_32, %c0_33] : memref<8x1xf32, #tpu.memory_space<vmem>>, vector<8x1xf32>
      %41 = tpu.reciprocal %40 {approx = true} : vector<8x1xf32> -> vector<8x1xf32>
      %c0_34 = arith.constant 0 : index
      %c0_35 = arith.constant 0 : index
      %42 = vector.load %arg11[%c0_34, %c0_35] : memref<8x8xf32, #tpu.memory_space<vmem>>, vector<8x8xf32>
      %43 = vector.broadcast %41 : vector<8x1xf32> to vector<8x8xf32>
      %44 = arith.mulf %42, %43 : vector<8x8xf32>
      %c0_36 = arith.constant 0 : index
      %c0_37 = arith.constant 0 : index
      %c0_38 = arith.constant 0 : index
      %c0_39 = arith.constant 0 : index
      %45 = vector.load %arg8[%c0_36, %c0_37, %c0_38, %c0_39] : memref<1x1x8x8xf32, #tpu.memory_space<vmem>>, vector<1x1x8x8xf32>
      %46 = vector.shape_cast %45 : vector<1x1x8x8xf32> to vector<8x8xf32>
      %47 = vector.shape_cast %44 : vector<8x8xf32> to vector<1x1x8x8xf32>
      tpu.vector_store %arg8[%c0_36, %c0_37, %c0_38, %c0_39], %47 {strides = array<i32>} : memref<1x1x8x8xf32, #tpu.memory_space<vmem>>, vector<1x1x8x8xf32>,
    } else {
    }
    return
  }
  func.func @transform_0(%arg0: i32, %arg1: i32, %arg2: i32, %arg3: i32) -> (i32, i32, i32) {
    %c0_i32 = arith.constant 0 : i32
    %c0_i32_0 = arith.constant 0 : i32
    return %arg0, %c0_i32, %arg3 : i32, i32, i32
  }
  func.func @transform_1(%arg0: i32, %arg1: i32, %arg2: i32, %arg3: i32) -> (i32, i32, i32, i32) {
    %c0_i32 = arith.constant 0 : i32
    %c0_i32_0 = arith.constant 0 : i32
    return %arg0, %arg1, %arg2, %c0_i32 : i32, i32, i32, i32
  }
  func.func @transform_2(%arg0: i32, %arg1: i32, %arg2: i32, %arg3: i32) -> (i32, i32, i32, i32) {
    %c0_i32 = arith.constant 0 : i32
    %c0_i32_0 = arith.constant 0 : i32
    return %arg0, %arg1, %arg3, %c0_i32 : i32, i32, i32, i32
  }
  func.func @transform_3(%arg0: i32, %arg1: i32, %arg2: i32, %arg3: i32) -> (i32, i32, i32, i32) {
    %c0_i32 = arith.constant 0 : i32
    %c0_i32_0 = arith.constant 0 : i32
    return %arg0, %arg1, %arg3, %c0_i32 : i32, i32, i32, i32
  }
  func.func @transform_4(%arg0: i32, %arg1: i32, %arg2: i32, %arg3: i32) -> (i32, i32, i32, i32) {
    %c0_i32 = arith.constant 0 : i32
    %c0_i32_0 = arith.constant 0 : i32
    return %arg0, %arg1, %arg2, %c0_i32 : i32, i32, i32, i32
  }
}

</mosaic_0001>

<bundles_post_ra>
// kernel: tpu_custom_call.1
= control target key start
LH: loop header
LB: loop body
LE: loop exit
PB: predicated region body
PF: predicated region fallthrough
CT: control target
= control target key end

     0   :  { %s1566_s0 = inlined_call_operand.hbm [shape: f32[2,1,8], index: 0, kind: input, shape index: {}]   ;;  %s1567_s1 = inlined_call_operand.hbm [shape: bf16[2,4,8,8], index: 1, kind: input, shape index: {}]   ;;  %s1568_s2 = inlined_call_operand.hbm [shape: bf16[2,4,8,8], index: 2, kind: input, shape index: {}]   ;;  %s1569_s3 = inlined_call_operand.hbm [shape: bf16[2,4,8,8], index: 3, kind: input, shape index: {}]   ;;  %s1570_s4 = inlined_call_operand.hbm [shape: f32[2,4,8,8], index: 4, kind: output, shape index: {}]  }
   0x1   :  { %1592 = sst [smem:[#allocation29_spill]] %s1567_s1 }
   0x2   :  { %1593 = sst [smem:[#allocation30_spill]] %s1570_s4 }
   0x3   :  { %9 = vsyncpa [#allocation6], 0 }
   0x4   :  { %11 = vsyncpa [#allocation6 + $0x1], 0 }
   0x5   :  { %12 = vsyncpa [#allocation9], 0 }
   0x6   :  { %14 = vsyncpa [#allocation9 + $0x1], 0 }
   0x7   :  { %15 = vsyncpa [#allocation12], 0 }
   0x8   :  { %17 = vsyncpa [#allocation12 + $0x1], 0 }
   0x9   :  { %18 = vsyncpa [#allocation7], 0 }
   0xa   :  { %20 = vsyncpa [#allocation7 + $0x1], 0  ;;  %s1172_s15 = smov 0   ;;  %s1174_s16 = smov 0  }
   0xb   :  { %s1176_s17 = smov 0   ;;  %s1178_s18 = smov 0  }
   0xc   :  { %s1180_s19 = smov 0   ;;  %s1182_s20 = smov 0  }
   0xd   :  { %s1184_s21 = smov 0   ;;  %s1186_s22 = smov 0  }
   0xe   :  { %s1188_s23 = smov 0   ;;  %s1190_s24 = smov 0  }
   0xf   :  { %s1192_s25 = smov 0  }
  0x10 LB: > { %1594 = sst [smem:[#allocation18_spill]] %s1096_s15  ;;  %s1228_s26 = sadd.s32 4294967295, %s1136_s25   ;;  %s1136_s25 = sphi %s1192_s25, %s26_s25   ;;  %s1132_s24 = sphi %s1190_s24, %s1640_s24   ;;  %s1128_s23 = sphi %s1188_s23, %s1639_s23   ;;  %s1124_s22 = sphi %s1186_s22, %s1638_s22   ;;  %s1120_s21 = sphi %s1184_s21, %s1637_s21   ;;  %s1116_s20 = sphi %s1182_s20, %s1636_s20   ;;  %s1112_s19 = sphi %s1180_s19, %s1645_s19   ;;  %s1108_s18 = sphi %s1178_s18, %s1644_s18   ;;  %s1104_s17 = sphi %s1176_s17, %s1643_s17   ;;  %s1100_s16 = sphi %s1174_s16, %s1642_s16   ;;  %s1096_s15 = sphi %s1172_s15, %s1641_s15  }
  0x11   : > { %1595 = sst [smem:[#allocation19_spill]] %s1116_s20  ;;  %s715_s27 = sadd.s32 4294967294, %s1136_s25  }
  0x12   : > { %1596 = sst [smem:[#allocation20_spill]] %s1128_s23  ;;  %s48_s28 = sadd.s32 1, %s1128_s23 }
  0x13   : > { %1597 = sst [smem:[#allocation21_spill]] %s1132_s24  ;;  %s52_s29 = sadd.s32 1, %s1132_s24 }
  0x14   : > { %1598 = sst [smem:[#allocation22_spill]] %s1136_s25  ;;  %p50_p0 = scmp.ge.s32.totalorder %s48_s28, 4 }
  0x15   : > { %p1580_p1 = scmp.eq.s32.totalorder %s1136_s25, 0  ;;  %p1576_p2 = scmp.eq.s32.totalorder %s1228_s26, 0 }
  0x16   : > { %s91_s30 = sadd.s32 1, %s1104_s17  ;;  %s1647_s28 = smov (%p50_p0, %s48_s28), 0 }
  0x17   : > { %1599 = sst [smem:[#allocation23_spill]] %s1647_s28  ;;  %s1649_s29 = smov (!%p50_p0, %s52_s29), %s1132_s24 }
  0x18   : > { %s85_s5 = ssub.s32 %s1128_s23, %s1647_s28  ;;  %p98_p3 = scmp.ne.s32.totalorder %s1104_s17, %s1100_s16 }
  0x19   : > { %p54_p4 = scmp.ge.s32.totalorder %s1649_s29, 2  ;;  %p104_p5 = scmp.ne.s32.totalorder %s1100_s16, %s1096_s15 }
  0x1a   : > { %p1247_p6 = por %p98_p3, %p1580_p1  ;;  %p192_p7 = scmp.eq.s32.totalorder %s1228_s26, 7 }
  0x1b   : > { %s1651_s29 = smov (%p54_p4, %s1649_s29), 0  ;;  %p1256_p8 = por %p104_p5, %p1576_p2 }
  0x1c   : > { %1601 = sst [smem:[#allocation24_spill]] %s1651_s29  ;;  %p1260_p9 = por %p192_p7, %p98_p3 }
  0x1d   : > { %s1602_s7 = scalar_select %p1256_p8, 1, 0 }
  0x1e   : > { %s1603_s8 = scalar_select %p1260_p9, 1, 0 }
  0x1f   : > { %s1266_s9 = ssub.s32 %s1132_s24, %s1651_s29  ;;  %p198_p10 = scmp.eq.s32.totalorder %s715_s27, 7 }
  0x20   : > { %1604 = sst [smem:[#allocation25_spill]] %s1603_s8  ;;  %s86_s10 = sor.u32 %s85_s5, %s1266_s9 }
  0x21   : > { %p89_p12 = scmp.eq.s32.totalorder %s86_s10, 0  ;;  %p1270_p13 = por %p198_p10, %p104_p5 }
  0x22   : > { %p1579_p0 = scmp.lt.s32.totalorder %s1136_s25, 8  ;;  %s236_s13 = sand.u32 1, %s1136_s25  }
  0x23   : > { %s1605_s11 = scalar_select %p1270_p13, 1, 0 }
  0x24   : > { %s1276_s12 = scalar_select %p89_p12, %s1104_s17, %s91_s30  }
  0x25   : > { %1606 = sst [smem:[#allocation26_spill]] %s1605_s11  ;;  %s1577_s14 = sand.u32 1, %s1104_s17  }
  0x26   : > { %1607 = sst [smem:[#allocation27_spill]] %s1276_s12  ;;  %s1282_s29 = sshll.u32 %s1577_s14, 2 }
  0x27   : > { %s720_s27 = sshll.u32 %s1132_s24, 2  ;;  %s240_s15 = scalar_lea.vmem [#allocation8], %s1282_s29 }
  0x28   : > { %s246_s28 = sadd.s32 %s1128_s23, %s720_s27  ;;  %s250_s5 = sshll.u32 %s240_s15, 4  ;;  %s1289_s5 = int_to_ptr.vmem [resolvable:$true] %s250_s5 }
  0x29   : > { %s1287_s4 = sshll.u32 %s246_s28, 6  ;;  %s1608_s1 = sld [smem:[#allocation29_spill]] }
  0x2a   : > { %p1301_p3 = pnand %p1579_p0, %p1247_p6  ;;  %s1307_s15 = scalar_lea.sflag [#allocation9], %s236_s13 }
  0x2c   : > { %s1609_s27 = scalar_select %p1301_p3, 1, 0 }
  0x2d   : > { %p1313_p10 = pneg %p1301_p3 }
  0x2f   : > { %s1295_s30 = scalar_lea.hbm %s1608_s1, %s1287_s4  ;;  %s891_s14 = scalar_lea.hbm %s1608_s1, 512 }
  0x30   : > { %s886_s28 = scalar_lea.hbm %s1295_s30, 64  ;;  %p892_p6 = scmp.lt.u32.totalorder %s1295_s30, %s1608_s1 }
  0x31   : > { %p887_p7 = scmp.ne.s32.totalorder %s1295_s30, %s886_s28  ;;  %p893_p0 = scmp.lt.u32.totalorder %s891_s14, %s886_s28 }
  0x32   : > { %p895_p11 = scmp.lt.u32.totalorder %s886_s28, %s1295_s30 }
  0x33   : > { %p889_p12 = pnand %p1313_p10, %p887_p7  ;;  %p894_p1 = por %p893_p0, %p892_p6 }
  0x35   : > { %p890_p2 = pneg %p889_p12  ;;  %p896_p4 = por %p895_p11, %p894_p1 }
  0x37   : > { %p897_p5 = pnand %p896_p4, %p890_p2 }
  0x39   : > { %900 = shalt.err (!%p897_p5)
}
  0x3a   : > { %s901_s13 = scalar_lea.vmem %s1289_s5, 64  ;;  %s1138_s6 = smov [#allocation8]  }
  0x3b   : > { %p902_p7 = scmp.ne.s32.totalorder %s1289_s5, %s901_s13  ;;  %s906_s10 = sshll.u32 %s1138_s6, 4  ;;  %s907_s10 = int_to_ptr.vmem [resolvable:$false] %s906_s10 }
  0x3c   : > { %s908_s23 = scalar_lea.vmem %s907_s10, 128  ;;  %p909_p9 = scmp.lt.s32.totalorder %s1289_s5, %s907_s10 }
  0x3d   : > { %p904_p12 = pnand %p902_p7, %p1313_p10  ;;  %p910_p8 = scmp.lt.s32.totalorder %s908_s23, %s901_s13 }
  0x3f   : > { %p905_p13 = pneg %p904_p12  ;;  %p911_p0 = por %p910_p8, %p909_p9 }
  0x41   : > { %p912_p6 = pnand %p911_p0, %p905_p13 }
  0x43   : > { %915 = shalt.err (!%p912_p6)
}
  0x44   : > { %773 = dma.hbm_to_vmem [thread:$0]  (!%p1301_p3), %s1295_s30, 64, %s1289_s5, %s1307_s15  }
  0x45   : > { %p1611_p1 = scmp.lt.s32.totalorder %s1136_s25, 9  ;;  %p1612_p2 = scmp.ge.s32.totalorder %s1136_s25, 1 }
  0x46   : > { %s61_s14 = sadd.s32 1, %s1116_s20  ;;  %p68_p9 = scmp.ne.s32.totalorder %s1116_s20, %s1112_s19 }
  0x47   : > { %p1341_p8 = pnand %p1612_p2, %p1611_p1  ;;  %p1614_p11 = scmp.eq.s32.totalorder %s1266_s9, 0 }
  0x48   : > { %p1616_p13 = scmp.eq.s32.totalorder %s1136_s25, 0  ;;  %p74_p5 = scmp.ne.s32.totalorder %s1112_s19, %s1108_s18 }
  0x49   : > { %s1613_s12 = scalar_select %p1341_p8, 1, 0 }
  0x4a   : > { %s1351_s28 = scalar_select %p1614_p11, %s1116_s20, %s61_s14  }
  0x4b   : > { %p70_p4 = por %p1616_p13, %p68_p9  ;;  %s218_s13 = sand.u32 1, %s1116_s20  }
  0x4c   : > { %1615 = sst [smem:[#allocation28_spill]] %s1351_s28  ;;  %s718_s6 = sshll.u32 %s1132_s24, 4 }
  0x4d   : > { %p1617_p7 = scmp.eq.s32.totalorder %s1228_s26, 0  ;;  %s1368_s23 = scalar_lea.hbm %s1566_s0, %s718_s6 }
  0x4e   : > { %s221_s9 = scalar_lea.vmem [#allocation5], %s218_s13  ;;  %p1619_p0 = scmp.lt.s32.totalorder %s1136_s25, 8 }
  0x4f   : > { %p1361_p12 = por %p1617_p7, %p74_p5  ;;  %s229_s14 = sshll.u32 %s221_s9, 4  ;;  %s1376_s14 = int_to_ptr.vmem [resolvable:$true] %s229_s14 }
  0x50   : > { %p1372_p6 = pnand %p1619_p0, %p70_p4  ;;  %s1382_s6 = scalar_lea.hbm %s1568_s2, %s1287_s4 }
  0x51   : > { %s1618_s10 = scalar_select %p1361_p12, 1, 0 }
  0x52   : > { %s219_s5 = scalar_lea.sflag [#allocation6], %s218_s13  ;;  %s916_s30 = scalar_lea.hbm %s1368_s23, 16 }
  0x53   : > { %p917_p1 = scmp.ne.s32.totalorder %s1368_s23, %s916_s30  ;;  %p918_p2 = pneg %p1372_p6 }
  0x54   : > { %s921_s20 = scalar_lea.hbm %s1566_s0, 32  ;;  %p922_p13 = scmp.lt.u32.totalorder %s1368_s23, %s1566_s0 }
  0x55   : > { %p919_p9 = pnand %p918_p2, %p917_p1  ;;  %p923_p4 = scmp.lt.u32.totalorder %s921_s20, %s916_s30 }
  0x56   : > { %p925_p7 = scmp.lt.u32.totalorder %s916_s30, %s1368_s23 }
  0x57   : > { %p920_p11 = pneg %p919_p9  ;;  %p924_p5 = por %p923_p4, %p922_p13 }
  0x59   : > { %p926_p0 = por %p925_p7, %p924_p5 }
  0x5b   : > { %p927_p12 = pnand %p926_p0, %p920_p11 }
  0x5d   : > { %930 = shalt.err (!%p927_p12)
}
  0x5e   : > { %s931_s1 = scalar_lea.vmem %s1376_s14, 16  ;;  %s1139_s24 = smov [#allocation5]  }
  0x5f   : > { %p932_p1 = scmp.ne.s32.totalorder %s1376_s14, %s931_s1  ;;  %s936_s28 = sshll.u32 %s1139_s24, 4  ;;  %s937_s28 = int_to_ptr.vmem [resolvable:$false] %s936_s28 }
  0x60   : > { %s938_s25 = scalar_lea.vmem %s937_s28, 32  ;;  %p939_p3 = scmp.lt.s32.totalorder %s1376_s14, %s937_s28 }
  0x61   : > { %p934_p9 = pnand %p932_p1, %p918_p2  ;;  %p940_p13 = scmp.lt.s32.totalorder %s938_s25, %s931_s1 }
  0x63   : > { %p935_p8 = pneg %p934_p9  ;;  %p941_p4 = por %p940_p13, %p939_p3 }
  0x65   : > { %p942_p5 = pnand %p941_p4, %p935_p8 }
  0x67   : > { %945 = shalt.err (!%p942_p5)
}
  0x68   : > { %770 = dma.hbm_to_vmem [thread:$0]  (!%p1372_p6), %s1368_s23, 16, %s1376_s14, %s219_s5  }
  0x69   : > { %s261_s20 = scalar_lea.vmem [#allocation10], %s1282_s29  ;;  %s946_s13 = scalar_lea.hbm %s1382_s6, 64 }
  0x6a   : > { %s271_s8 = sshll.u32 %s261_s20, 4  ;;  %p947_p12 = scmp.ne.s32.totalorder %s1382_s6, %s946_s13  ;;  %s272_s8 = int_to_ptr.vmem [resolvable:$true] %s271_s8 }
  0x6b   : > { %s951_s18 = scalar_lea.hbm %s1568_s2, 512  ;;  %p952_p2 = scmp.lt.u32.totalorder %s1382_s6, %s1568_s2 }
  0x6c   : > { %p949_p3 = pnand %p947_p12, %p1313_p10  ;;  %p953_p11 = scmp.lt.u32.totalorder %s951_s18, %s946_s13 }
  0x6d   : > { %p955_p0 = scmp.lt.u32.totalorder %s946_s13, %s1382_s6 }
  0x6e   : > { %p950_p8 = pneg %p949_p3  ;;  %p954_p7 = por %p953_p11, %p952_p2 }
  0x70   : > { %p956_p6 = por %p955_p0, %p954_p7 }
  0x72   : > { %p957_p1 = pnand %p956_p6, %p950_p8 }
  0x74   : > { %960 = shalt.err (!%p957_p1)
}
  0x75   : > { %s961_s23 = scalar_lea.vmem %s272_s8, 64  ;;  %s1140_s14 = smov [#allocation10]  }
  0x76   : > { %p962_p9 = scmp.ne.s32.totalorder %s272_s8, %s961_s23  ;;  %s966_s5 = sshll.u32 %s1140_s14, 4  ;;  %s967_s5 = int_to_ptr.vmem [resolvable:$false] %s966_s5 }
  0x77   : > { %s968_s28 = scalar_lea.vmem %s967_s5, 128  ;;  %p969_p5 = scmp.lt.s32.totalorder %s272_s8, %s967_s5 }
  0x78   : > { %p964_p13 = pnand %p962_p9, %p1313_p10  ;;  %p970_p12 = scmp.lt.s32.totalorder %s968_s28, %s961_s23 }
  0x7a   : > { %p965_p4 = pneg %p964_p13  ;;  %p971_p3 = por %p970_p12, %p969_p5 }
  0x7c   : > { %p972_p2 = pnand %p971_p3, %p965_p4 }
  0x7e   : > { %975 = shalt.err (!%p972_p2)
}
  0x7f   : > { %p1621_p11 = scmp.ne.s32.totalorder %s1609_s27, 0  ;;  %s1432_s13 = scalar_lea.hbm %s1569_s3, %s1287_s4 }
  0x80   : > { %s282_s30 = scalar_lea.vmem [#allocation11], %s1282_s29  ;;  %s1622_s18 = sand.u32 1, %s1104_s17  }
  0x81   : > { %776 = dma.hbm_to_vmem [thread:$0]  (!%p1621_p11), %s1382_s6, 64, %s272_s8, %s1307_s15  }
  0x82   : > { %s292_s9 = sshll.u32 %s282_s30, 4  ;;  %s279_s1 = scalar_lea.sflag [#allocation12], %s1622_s18  ;;  %s293_s9 = int_to_ptr.vmem [resolvable:$true] %s292_s9 }
  0x83   : > { %s976_s24 = scalar_lea.hbm %s1432_s13, 64  ;;  %s981_s8 = scalar_lea.hbm %s1569_s3, 512 }
  0x84   : > { %p977_p8 = scmp.ne.s32.totalorder %s1432_s13, %s976_s24  ;;  %p982_p6 = scmp.lt.u32.totalorder %s1432_s13, %s1569_s3 }
  0x85   : > { %p983_p1 = scmp.lt.u32.totalorder %s981_s8, %s976_s24  ;;  %p985_p13 = scmp.lt.u32.totalorder %s976_s24, %s1432_s13 }
  0x86   : > { %p979_p7 = pnand %p977_p8, %p1313_p10 }
  0x87   : > { %p984_p9 = por %p983_p1, %p982_p6 }
  0x88   : > { %p980_p0 = pneg %p979_p7 }
  0x89   : > { %p986_p4 = por %p985_p13, %p984_p9 }
  0x8b   : > { %p987_p5 = pnand %p986_p4, %p980_p0 }
  0x8d   : > { %990 = shalt.err (!%p987_p5)
}
  0x8e   : > { %s991_s29 = scalar_lea.vmem %s293_s9, 64  ;;  %s1141_s14 = smov [#allocation11]  }
  0x8f   : > { %p992_p12 = scmp.ne.s32.totalorder %s293_s9, %s991_s29  ;;  %s996_s5 = sshll.u32 %s1141_s14, 4  ;;  %s997_s5 = int_to_ptr.vmem [resolvable:$false] %s996_s5 }
  0x90   : > { %s998_s28 = scalar_lea.vmem %s997_s5, 128  ;;  %p999_p8 = scmp.lt.s32.totalorder %s293_s9, %s997_s5 }
  0x91   : > { %p994_p3 = pnand %p992_p12, %p1313_p10  ;;  %p1000_p7 = scmp.lt.s32.totalorder %s998_s28, %s991_s29 }
  0x93   : > { %p995_p2 = pneg %p994_p3  ;;  %p1001_p11 = por %p1000_p7, %p999_p8 }
  0x95   : > { %p1002_p1 = pnand %p1001_p11, %p995_p2 }
  0x97   : > { %1005 = shalt.err (!%p1002_p1)
}
  0x98   : > { %p1623_p6 = scmp.ne.s32.totalorder %s1609_s27, 0  ;;  %p1624_p0 = scmp.ne.s32.totalorder %s1613_s12, 0 }
  0x99   : > { %s303_s11 = sand.u32 (!%p1624_p0), 1, %s1112_s19   ;;  %p1625_p10 = scmp.ne.s32.totalorder (!%p1624_p0), %s1618_s10, 0 }
  0x9a   : > { %779 = dma.hbm_to_vmem [thread:$0]  (!%p1623_p6), %s1432_s13, 64, %s293_s9, %s279_s1  }
  0x9b   : > { %301 = sbr.rel (%p1624_p0) target bundleno = 991 (0x3df), region = 36  ;;  %s304_s25 = scalar_lea.sflag (!%p1624_p0), [#allocation6], %s303_s11 }
  0x9c   : > { %s1457_s20 = scalar_lea.vmem (!%p1624_p0), [#allocation5], %s303_s11 }
  0xa2   : > { %1079 = dma.done.wait (%p1625_p10), %s304_s25, 16  }
  0xa3   : > { %1081 = vsyncadd (%p1625_p10), %s304_s25, 4294967280  ;;  %s311_s27 = sand.u32 1, %s1228_s26   ;;  %s1465_s30 = sand.u32 1, %s1100_s16  }
  0xa4   : > { %s1468_s12 = sshll.u32 %s1465_s30, 2  ;;  %s312_s13 = scalar_lea.sflag [#allocation9], %s311_s27 }
  0xa5   : > { %s315_s9 = scalar_lea.vmem [#allocation8], %s1468_s12  ;;  %p1626_p11 = scmp.ne.s32.totalorder %s1602_s7, 0 }
  0xa7   : > { %1083 = dma.done.wait (%p1626_p11), %s312_s13, 128  }
  0xa8   : > { %1085 = vsyncadd (%p1626_p11), %s312_s13, 4294967168  ;;  %s324_s10 = scalar_lea.vmem [#allocation10], %s1468_s12  ;;  %s330_s18 = scalar_lea.sflag [#allocation12], %s1465_s30 }
  0xa9   : > { %s333_s26 = scalar_lea.vmem [#allocation11], %s1468_s12 }
  0xaa   : > { %1087 = dma.done.wait (%p1626_p11), %s330_s18, 64  }
  0xab   : > { %1089 = vsyncadd (%p1626_p11), %s330_s18, 4294967232  ;;  %vm380_vm0 = vcmask 64512   ;;  %v1142_v0 = vmov 0.0   ;;  %vm1143_vm1 = vmmov 0   ;;  %v383_v1 = vld [vmem:[%s324_s10] sm:$0xf] }
  0xac   : > { %745 = vmatprep.subr.bf16.mxu0 %v1142_v0  ;;  %381 = vst.msk [vmem:[#allocation4] sm:$0xff] %vm380_vm0, %v1142_v0  ;;  %747 = vmatprep.mubr.msk.bf16.mxu0 %vm1143_vm1, %v1142_v0  ;;  %v397_v2 = vsel %vm380_vm0, %v383_v1, 0  ;;  %v382_v3 = vld [vmem:[%s315_s9] sm:$0xf]  ;;  %vm377_vm2 = vcmask 7168   ;;  %v1145_v12 = vmov 0  }
  0xad   : > { %751 = vmatprep.subr.bf16.mxu1 %v1142_v0  ;;  %753 = vmatprep.mubr.msk.bf16.mxu1 %vm1143_vm1, %v1142_v0  ;;  %v1144_v4 = vmov -1e+30   ;;  %379 = vst.msk [vmem:[#allocation3] sm:$0xff] %vm377_vm2, %v1142_v0  ;;  %v733_v5 = vld [vmem:[%s1457_s20] ss:$0 sm:$0xff]  ;;  %vm474_vm3 = vcmask 1043456  }
  0xae   : > { %746 = vmatpush3.bf16.xpose.msra.mxu0 %v397_v2  ;;  %378 = vst.msk [vmem:[#allocation2] sm:$0xff] %vm377_vm2, %v1144_v4  ;;  %878 = vset.pattern.permute.xlu0 %v1145_v12  ;;  %v384_v17 = vld [vmem:[%s333_s26] sm:$0xf]  ;;  %s1627_s7 = sld [smem:[#allocation25_spill]]  ;;  %s732_s1 = sshll.u32 %s1465_s30, 3 }
  0xaf   : > { %879 = vset.pattern.permute.xlu1 %v1145_v12  ;;  %v476_v18 = vsel %vm474_vm3, %v384_v17, 0  ;;  %s737_s24 = sshll.u32 %s1124_s22, 2  ;;  %s371_s8 = scalar_lea.vmem [#allocation13], %s732_s1 }
  0xb0   : > { %752 = vmatpush3.bf16.msra.mxu1 %v476_v18  ;;  %s547_s15 = sadd.s32 %s1120_s21, %s737_s24  ;;  %s551_s4 = sshll.u32 %s371_s8, 4  ;;  %s1504_s4 = int_to_ptr.vmem [resolvable:$true] %s551_s4 }
  0xb1   : > { %s738_s6 = sshll.u32 %s547_s15, 7  ;;  %s1628_s14 = sld [smem:[#allocation30_spill]] }
  0xb2   : > { %s535_s22 = scalar_lea.sflag [#allocation7], %s1465_s30  ;;  %s1006_s21 = scalar_lea.vmem %s1504_s4, 128 }
  0xb3   : > { %v463_v33 = vld [vmem:[#allocation4] sm:$0xff]  ;;  %p1007_p9 = scmp.ne.s32.totalorder %s1504_s4, %s1006_s21  ;;  %s1146_s28 = smov [#allocation13]  }
  0xb4   : > { %v455_v27 = vld [vmem:[#allocation3] sm:$0xff]  ;;  %p1629_p13 = scmp.ne.s32.totalorder %s1627_s7, 0  ;;  %s1010_s11 = sshll.u32 %s1146_s28, 4  ;;  %s1011_s11 = int_to_ptr.vmem [resolvable:$false] %s1010_s11 }
  0xb5   : > { %748 = vmatmul.mubr.msk.bf16.vlgmr.msra.gmra.mrb[0].mxu0 %vm380_vm0, %v382_v3  ;;  %v439_v13 = vld [vmem:[#allocation2] sm:$0xff]  ;;  %s1012_s25 = scalar_lea.vmem %s1011_s11, 256  ;;  %p1013_p12 = scmp.lt.s32.totalorder %s1504_s4, %s1011_s11 }
  0xb6   : > { %p1008_p4 = pnand %p1007_p9, %p1629_p13  ;;  %p1014_p3 = scmp.lt.s32.totalorder %s1012_s25, %s1006_s21 }
  0xb7   : > { %s1502_s5 = scalar_lea.hbm %s1628_s14, %s738_s6 }
  0xb8   : > { %p1009_p5 = pneg %p1008_p4  ;;  %p1015_p2 = por %p1014_p3, %p1013_p12 }
  0xba   : > { %p1016_p8 = pnand %p1015_p2, %p1009_p5 }
 0x188   : > { %v433_v6 = vpop.f32.mrb[0].mxu0 }
 0x189   : > { %v434_v7 = vadd.f32 %v733_v5, %v433_v6  ;;  %v749_v8 = vpop.f32.mrb[1].mxu0 }
 0x18a   : > { %v436_v9 = vpop.f32.mrb[2].mxu0 }
 0x18b   : > { %v750_v10 = vpop.f32.mrb[3].mxu0  ;;  %v440_v11 = vsel %vm380_vm0, %v434_v7, -inf }
 0x18c   : > { %441 = vmax.xlane.f32.xlu0 %v440_v11 }
 0x219   : > { %v442_v14 = vpop.xlane.xlu0 %441 }
 0x21a   : > { %v443_v15 = vmax.f32 %v439_v13, %v442_v14 }
 0x21c   : > { %v444_v16 = vsub.f32 %v439_v13, %v443_v15  ;;  %520 = vst.msk [vmem:[#allocation2] sm:$0xff] %vm377_vm2, %v443_v15  ;;  %449 = vperm.xlu0 %878, %v443_v15  }
 0x21e   : > { %v445_v25 = vmul.f32 1.442695, %v444_v16 }
 0x29b   : > { %v450_v19 = vpop.permute.xlu0 %449 }
 0x29c   : > { %v452_v20 = vsub.f32 %v434_v7, %v450_v19 }
 0x29e   : > { %v453_v21 = vmul.f32 1.442695, %v452_v20 }
 0x2a0   : > { %880 = vpow2.f32 %v453_v21 }
 0x2a1   : > { %882 = vpow2.f32 %v445_v25 }
 0x2aa   : > { %v881_v22 = vpop.eup %880 }
 0x2ab   : > { %v457_v23 = vsel %vm380_vm0, %v881_v22, 0.0  ;;  %v470_v24 = vpack.c.bf16 %v881_v22, %v881_v22  ;;  %v883_v26 = vpop.eup %882 }
 0x2ac   : > { %458 = vadd.xlane.f32.xlu1 %v457_v23  ;;  %v456_v28 = vmul.f32 %v883_v26, %v455_v27 }
 0x2ad   : > { %754 = vmatmul.mubr.msk.bf16.vlgmr.msra.gmra.mrb[0].mxu1 %vm380_vm0, %v470_v24 }
 0x2bd   : > { %466 = vperm.xlu1 %879, %v883_v26  }
 0x339   : > { %v459_v29 = vpop.xlane.xlu1 %458 }
 0x33a   : > { %v460_v30 = vadd.f32 %v459_v29, %v456_v28 }
 0x33c   : > { %462 = vst.msk [vmem:[#allocation3] sm:$0xff] %vm377_vm2, %v460_v30 }
 0x33d   : > { %v467_v34 = vpop.permute.xlu1 %466 }
 0x33e   : > { %v469_v35 = vmul.f32 %v467_v34, %v463_v33 }
 0x343   : > { %v524_v31 = vld [vmem:[#allocation3] sm:$0xff] }
 0x344   : > { %884 = vrcp.f32 %v524_v31 }
 0x34e   : > { %v885_v32 = vpop.eup %884 }
 0x34f   : > { %529 = vperm.xlu1 %879, %v885_v32  }
 0x380   : > { %v512_v36 = vpop.f32.mrb[0].mxu1 }
 0x381   : > { %v518_v37 = vadd.f32 %v512_v36, %v469_v35  ;;  %v755_v38 = vpop.f32.mrb[1].mxu1 }
 0x382   : > { %v515_v39 = vpop.f32.mrb[2].mxu1 }
 0x383   : > { %519 = vst.msk [vmem:[#allocation4] sm:$0xff] %vm380_vm0, %v518_v37  ;;  %v756_v40 = vpop.f32.mrb[3].mxu1 }
 0x38a   : > { %v526_v41 = vld [vmem:[#allocation4] sm:$0xff] }
 0x3ce   : > { %v530_v42 = vpop.permute.xlu1 %529 }
 0x3cf   : > { %v532_v43 = vmul.f32 %v530_v42, %v526_v41 }
 0x3d1   : > { %533 = vst.msk [vmem:[%s371_s8] sm:$0xff] %vm380_vm0, %v532_v43 }
 0x3d2   : > { %1019 = shalt.err (!%p1016_p8)
}
 0x3d3   : > { %s1020_s20 = scalar_lea.hbm %s1502_s5, 128  ;;  %s1024_s12 = scalar_lea.hbm %s1628_s14, 1024 }
 0x3d4   : > { %p1021_p7 = scmp.ne.s32.totalorder %s1502_s5, %s1020_s20  ;;  %p1025_p0 = scmp.lt.u32.totalorder %s1502_s5, %s1628_s14 }
 0x3d5   : > { %p1026_p10 = scmp.lt.u32.totalorder %s1024_s12, %s1020_s20  ;;  %p1028_p9 = scmp.lt.u32.totalorder %s1020_s20, %s1502_s5 }
 0x3d6   : > { %p1022_p1 = pnand %p1021_p7, %p1629_p13 }
 0x3d7   : > { %p1027_p11 = por %p1026_p10, %p1025_p0 }
 0x3d8   : > { %p1023_p6 = pneg %p1022_p1 }
 0x3d9   : > { %p1029_p4 = por %p1028_p9, %p1027_p11 }
 0x3db   : > { %p1030_p5 = pnand %p1029_p4, %p1023_p6 }
 0x3dd   : > { %1033 = shalt.err (!%p1030_p5)
}
 0x3de   : > { %765 = dma.vmem_to_hbm [thread:$0]  (%p1629_p13), %s1504_s4, 128, %s1502_s5, %s535_s22  }
 0x3df PF: > { %s1630_s10 = sld [smem:[#allocation22_spill]]  ;;  %s1631_s18 = sld [smem:[#allocation18_spill]] }
 0x3e0   : > { %s1632_s26 = sld [smem:[#allocation26_spill]] }
 0x3e5   : > { %p785_p12 = scmp.ge.s32.totalorder %s1630_s10, 2  ;;  %s563_s1 = sand.u32 1, %s1631_s18  }
 0x3e6   : > { %p1633_p3 = scmp.ne.s32.totalorder %s1632_s26, 0  ;;  %s564_s24 = scalar_lea.sflag [#allocation7], %s563_s1 }
 0x3e8   : > { %p781_p2 = pnand %p785_p12, %p1633_p3 }
 0x3ea   : > { %1091 = dma.done.wait (!%p781_p2), %s564_s24, 128  }
 0x3eb   : > { %1093 = vsyncadd (!%p781_p2), %s564_s24, 4294967168  ;;  %s26_s25 = sadd.s32 1, %s1630_s10   ;;  %s1634_s7 = sld [smem:[#allocation27_spill]] }
 0x3ec   : > { %p23_p8 = scmp.ge.s32.totalorder %s26_s25, 10   ;;  %s1635_s6 = sld [smem:[#allocation19_spill]] }
 0x3ed   : > { %s1636_s20 = sld [smem:[#allocation28_spill]]  ;;  %s1637_s21 = sld [smem:[#allocation20_spill]] }
 0x3ee   : > { %s1638_s22 = sld [smem:[#allocation21_spill]]  ;;  %s1639_s23 = sld [smem:[#allocation23_spill]] }
 0x3ef   : > { %s1640_s24 = sld [smem:[#allocation24_spill]]  ;;  %s1641_s15 = smov %s1100_s16 }
 0x3f0   : > { %s1642_s16 = smov %s1104_s17  ;;  %s1644_s18 = smov %s1112_s19 }
 0x3f1   : > { %s1643_s17 = smov %s1634_s7  ;;  %25 = sbr.rel (!%p23_p8) target bundleno = 16 (0x10), region = 126 }
 0x3f2   : > { %s1645_s19 = smov %s1635_s6 }
 0x3f8   :  { %569 = vsyncpa [#allocation6], 1 }
 0x3f9   :  { %571 = vsyncpa [#allocation6 + $0x1], 1 }
 0x3fa   :  { %572 = vsyncpa [#allocation9], 1 }
 0x3fb   :  { %574 = vsyncpa [#allocation9 + $0x1], 1 }
 0x3fc   :  { %575 = vsyncpa [#allocation12], 1 }
 0x3fd   :  { %577 = vsyncpa [#allocation12 + $0x1], 1 }
 0x3fe   :  { %578 = vsyncpa [#allocation7], 1 }
 0x3ff   :  { %580 = vsyncpa [#allocation7 + $0x1], 1 }

</bundles_post_ra>
